<compile_context>
chip_gen: v7x
topology: tpu7x:2x2x1
jax: 0.10.0
libtpu: 0.0.40
codegen_flags: <defaults>
</compile_context>

<pallas_src>
from functools import partial

import jax
import jax.numpy as jnp
from jax.experimental import pallas as pl
from jax.experimental.pallas import tpu as pltpu


def _cdiv(a, b):
    return -(-a // b)


def _round_up(x, m):
    return _cdiv(x, m) * m


def _vmem_capacity_bytes():
    """Physical VMEM per TensorCore; conservative fallback if the query is unavailable."""
    try:
        cap = getattr(pltpu.get_tpu_info(), "vmem_capacity_bytes", None)
        if cap:
            return int(cap)
    except Exception:
        pass
    return 64 << 20  # v7x per-TC size; a safe lower bound on v5e/v6e as well


def _choose_row_tile(Rp, per_row_bytes, budget_bytes, resident_bytes):
    """Largest 8-aligned row tile fitting the VMEM budget (cap 2048 rows), adjusted so the
    parallel grid axis has an even number of >= 2 steps (v7x has 2 TensorCores)."""
    if Rp <= 8:
        return Rp
    avail = max(8 * per_row_bytes, budget_bytes - resident_bytes)
    rt = min(Rp, 2048, avail // per_row_bytes)
    rt = max(8, (rt // 8) * 8)
    steps = max(2, _cdiv(Rp, rt))
    if steps % 2:
        steps += 1
    return max(8, _round_up(_cdiv(Rp, steps), 8))


def _patch_embed_kernel(x_ref, aux_ref, wpatch_ref, wbce_ref, out_ref):
    # x_ref:      (rt, P*P)    bf16  im2col'd patch pixels (one row per output token)
    # aux_ref:    (rt, 1+Cin)  f32   [1 | one_hot(channel)] per row
    # wpatch_ref: (P*P, Dp)    bf16  conv weight (resident, tiny)
    # wbce_ref:   (1+Cin, Dp)  f32   [bias; channel_embed] (resident, tiny; kept f32)
    # out_ref:    (rt, Dp)     out_dtype (bf16 default), lane-dense
    x = x_ref[...]
    if x.dtype != jnp.bfloat16:          # fallback cast if a producer ever sends f32 patches
        x = x.astype(jnp.bfloat16)
    acc = jnp.dot(x, wpatch_ref[...], preferred_element_type=jnp.float32)
    acc = acc + jnp.dot(aux_ref[...], wbce_ref[...], preferred_element_type=jnp.float32)
    out_ref[...] = acc.astype(out_ref.dtype)


@partial(jax.jit, static_argnames=("patch_size", "out_dtype"))
def _patch_embed_forward(x, channels, proj_w, proj_b, channel_embed_w, *, patch_size,
                         out_dtype):
    B, Cin, H, W = x.shape
    P = patch_size
    if H % P or W % P:
        raise ValueError(f"H={H}, W={W} must be divisible by patch_size={P} "
                         "(the reference Conv3d would silently truncate).")
    Hp, Wp = H // P, W // P
    D = proj_w.shape[0]

    K = P * P                   # contraction length: one patch
    Ca = 1 + Cin                # bias column + one-hot channel columns
    Rp = B * Cin * Hp * Wp      # one row per output token, ordered (b, c, hp, wp)
    Dp = _round_up(D, 128)      # lane-dense output; Dp == D whenever D % 128 == 0

    # ---- im2col + bf16 cast: one fused XLA pass over x (read f32, write bf16) ----
    # (b, c, hp, kh, wp, kw) -> (b, c, hp, wp, kh, kw) -> (Rp, P*P)
    x_patches = (x.astype(jnp.bfloat16)
                  .reshape(B, Cin, Hp, P, Wp, P)
                  .transpose(0, 1, 2, 4, 3, 5)
                  .reshape(Rp, K))

    # ---- tiny resident weights (cacheable per model; negligible per call) ----
    w_patch = jnp.pad(proj_w.reshape(D, K).T, ((0, 0), (0, Dp - D))).astype(jnp.bfloat16)
    ce = channel_embed_w[channels]                                     # (Cin, D)
    w_bce = jnp.pad(jnp.concatenate([proj_b[None, :], ce], axis=0),
                    ((0, 0), (0, Dp - D))).astype(jnp.float32)          # (1+Cin, Dp)

    chan_idx = jnp.broadcast_to(
        jnp.arange(Cin, dtype=jnp.int32)[None, :, None], (B, Cin, Hp * Wp)).reshape(Rp)
    aux = jnp.concatenate(
        [jnp.ones((Rp, 1), jnp.float32),
         jax.nn.one_hot(chan_idx, Cin, dtype=jnp.float32)], axis=1)     # (Rp, 1+Cin)

    # ---- per-generation VMEM budget & row tiling ----
    out_bytes = jnp.dtype(out_dtype).itemsize
    cap = _vmem_capacity_bytes()
    budget = max(16 << 20, min(int(cap * 0.70), 100 << 20))    # tile-choice budget
    vmem_limit = max(32 << 20, min(int(cap * 0.85), 128 << 20))
    per_row = (2 * K * 2                 # x tile, bf16, double-buffered
               + 2 * Ca * 4              # aux tile, f32, double-buffered
               + 2 * Dp * out_bytes      # output tile, double-buffered
               + 2 * Dp * 4)             # two live f32 dot results in the kernel body
    resident = 2 * (K * Dp * 2 + Ca * Dp * 4)    # weights (default-double-buffered, tiny)
    rt = _choose_row_tile(Rp, per_row, budget, resident)
    grid = (_cdiv(Rp, rt),)              # ragged last block is fine: rows are independent

    flops = 2 * Rp * (K + Ca) * Dp
    bytes_accessed = (Rp * K * 2 + Rp * Ca * 4 + K * Dp * 2 + Ca * Dp * 4
                      + Rp * Dp * out_bytes)

    out = pl.pallas_call(
        _patch_embed_kernel,
        out_shape=jax.ShapeDtypeStruct((Rp, Dp), out_dtype),
        grid=grid,
        in_specs=[
            pl.BlockSpec((rt, K), lambda i: (i, 0)),
            pl.BlockSpec((rt, Ca), lambda i: (i, 0)),
            pl.BlockSpec((K, Dp), lambda i: (0, 0)),    # constant block index -> no re-DMA
            pl.BlockSpec((Ca, Dp), lambda i: (0, 0)),   # constant block index -> no re-DMA
        ],
        out_specs=pl.BlockSpec((rt, Dp), lambda i: (i, 0)),
        compiler_params=pltpu.CompilerParams(
            dimension_semantics=("parallel",),
            vmem_limit_bytes=vmem_limit,
        ),
        cost_estimate=pl.CostEstimate(
            flops=flops, transcendentals=0, bytes_accessed=bytes_accessed),
    )(x_patches, aux, w_patch, w_bce)

    # (Rp, Dp) -> (B, Cin*Hp*Wp, D).  When Dp == D (any D % 128 == 0, e.g. 384/768/1024)
    # this is a free reshape; otherwise the depad slice is one extra pass over the output
    # (consumers that can read the padded layout should take the kernel output directly).
    if Dp != D:
        out = out[:, :D]
    return out.reshape(B, Cin * Hp * Wp, D)


def patch_embed_per_channel(x, channels, proj_w, proj_b, channel_embed_w, patch_size,
                            out_dtype=jnp.bfloat16):
    """Eval-mode forward of PatchEmbedPerChannel.

    x: (B, Cin, H, W); channels: (Cin,) int32; proj_w: (D, 1, 1, P, P); proj_b: (D,);
    channel_embed_w: (num_embeddings, D).  Returns (tokens (B, Cin*Hp*Wp, D), Cin).
    """
    tokens = _patch_embed_forward(x, channels, proj_w, proj_b, channel_embed_w,
                                  patch_size=patch_size, out_dtype=out_dtype)
    return tokens, x.shape[1]


if __name__ == "__main__":
    # Small shapes consistent with the module (the PyTorch repeat hardcodes a 4x4 patch grid,
    # so img_size / patch_size = 4).
    B, Cin, H, W = 2, 4, 16, 16
    P, D = 4, 32

    key = jax.random.PRNGKey(0)
    k1, k2, k3, k4 = jax.random.split(key, 4)

    x = jax.random.normal(k1, (B, Cin, H, W), dtype=jnp.float32)
    proj_w = jax.random.normal(k2, (D, 1, 1, P, P), dtype=jnp.float32) * 0.05
    proj_b = jax.random.normal(k3, (D,), dtype=jnp.float32) * 0.02
    # trunc_normal_(std=0.02) approximated deterministically by a clipped normal
    channel_embed_w = jnp.clip(
        jax.random.normal(k4, (Cin, D), dtype=jnp.float32) * 0.02, -0.04, 0.04)
    channels = jnp.arange(Cin, dtype=jnp.int32)   # extra_tokens['channels']

    # TODO(synk): training-mode channel sampling / channel dropout are host-side Python
    # randomness in the reference; only the eval forward is implemented.

    out, cin = patch_embed_per_channel(x, channels, proj_w, proj_b, channel_embed_w, P)
    out = jax.block_until_ready(out)

    # Plain-JAX f32 reference
    Hp, Wp = H // P, W // P
    ref_p = x.reshape(B, Cin, Hp, P, Wp, P).transpose(0, 1, 2, 4, 3, 5)
    ref_p = ref_p.reshape(B, Cin, Hp * Wp, P * P)
    ref = ref_p @ proj_w.reshape(D, P * P).T + proj_b
    ref = ref + channel_embed_w[channels][:, None, :]
    ref = ref.reshape(B, Cin * Hp * Wp, D)

    assert out.shape == (B, Cin * Hp * Wp, D), out.shape
    assert out.dtype == jnp.bfloat16
    assert cin == Cin
    out_f32 = out.astype(jnp.float32)
    max_err = float(jnp.max(jnp.abs(out_f32 - ref)))
    # Tolerance loosened for bf16 MXU inputs and bf16 output (accumulation stays f32).
    assert jnp.allclose(out_f32, ref, atol=2e-2, rtol=2e-2), max_err
    print("KERNEL_OK")
</pallas_src>

<mosaic_0001>
module attributes {stable_mosaic.version = 11 : i64} {
  func.func @_patch_embed_kernel(%arg0: i32, %arg1: memref<64x16xbf16, #tpu.memory_space<vmem>>, %arg2: memref<64x5xf32, #tpu.memory_space<vmem>>, %arg3: memref<16x128xbf16, #tpu.memory_space<vmem>>, %arg4: memref<5x128xf32, #tpu.memory_space<vmem>>, %arg5: memref<64x128xbf16, #tpu.memory_space<vmem>>) attributes {dimension_semantics = [#tpu.dimension_semantics<parallel>], iteration_bounds = array<i64: 2>, scalar_prefetch = 0 : i64, scratch_operands = 0 : i64, tpu.core_type = #tpu.core_type<tc>, window_params = [{transform_indices = @transform_0, window_bounds = array<i64: 64, 16>}, {transform_indices = @transform_1, window_bounds = array<i64: 64, 5>}, {pipeline_mode = #tpu.pipeline_mode<synchronous>, transform_indices = @transform_2, window_bounds = array<i64: 16, 128>}, {pipeline_mode = #tpu.pipeline_mode<synchronous>, transform_indices = @transform_3, window_bounds = array<i64: 5, 128>}, {transform_indices = @transform_4, window_bounds = array<i64: 64, 128>}]} {
    %c0 = arith.constant 0 : index
    %c0_0 = arith.constant 0 : index
    %0 = vector.load %arg1[%c0, %c0_0] : memref<64x16xbf16, #tpu.memory_space<vmem>>, vector<64x16xbf16>
    %c0_1 = arith.constant 0 : index
    %c0_2 = arith.constant 0 : index
    %1 = vector.load %arg3[%c0_1, %c0_2] : memref<16x128xbf16, #tpu.memory_space<vmem>>, vector<16x128xbf16>
    %cst = arith.constant dense<0.000000e+00> : vector<64x128xf32>
    %2 = tpu.matmul %0, %1, %cst {dimension_numbers = #tpu.dot_dimension_numbers<[1], [0], [0], [1], [0, 0, 1, 1], [], []>} : vector<64x16xbf16>, vector<16x128xbf16>, vector<64x128xf32> -> vector<64x128xf32>
    %c0_3 = arith.constant 0 : index
    %c0_4 = arith.constant 0 : index
    %3 = vector.load %arg2[%c0_3, %c0_4] : memref<64x5xf32, #tpu.memory_space<vmem>>, vector<64x5xf32>
    %c0_5 = arith.constant 0 : index
    %c0_6 = arith.constant 0 : index
    %4 = vector.load %arg4[%c0_5, %c0_6] : memref<5x128xf32, #tpu.memory_space<vmem>>, vector<5x128xf32>
    %cst_7 = arith.constant dense<0.000000e+00> : vector<64x128xf32>
    %5 = tpu.matmul %3, %4, %cst_7 {dimension_numbers = #tpu.dot_dimension_numbers<[1], [0], [0], [1], [0, 0, 1, 1], [], []>} : vector<64x5xf32>, vector<5x128xf32>, vector<64x128xf32> -> vector<64x128xf32>
    %6 = arith.addf %2, %5 : vector<64x128xf32>
    %7 = arith.truncf %6 : vector<64x128xf32> to vector<64x128xbf16>
    %c0_8 = arith.constant 0 : index
    %c0_9 = arith.constant 0 : index
    %8 = vector.load %arg5[%c0_8, %c0_9] : memref<64x128xbf16, #tpu.memory_space<vmem>>, vector<64x128xbf16>
    tpu.vector_store %arg5[%c0_8, %c0_9], %7 {strides = array<i32>} : memref<64x128xbf16, #tpu.memory_space<vmem>>, vector<64x128xbf16>,
    return
  }
  func.func @transform_0(%arg0: i32) -> (i32, i32) {
    %c0_i32 = arith.constant 0 : i32
    %c0_i32_0 = arith.constant 0 : i32
    return %arg0, %c0_i32 : i32, i32
  }
  func.func @transform_1(%arg0: i32) -> (i32, i32) {
    %c0_i32 = arith.constant 0 : i32
    %c0_i32_0 = arith.constant 0 : i32
    return %arg0, %c0_i32 : i32, i32
  }
  func.func @transform_2(%arg0: i32) -> (i32, i32) {
    %c0_i32 = arith.constant 0 : i32
    %c0_i32_0 = arith.constant 0 : i32
    %c0_i32_1 = arith.constant 0 : i32
    return %c0_i32, %c0_i32_0 : i32, i32
  }
  func.func @transform_3(%arg0: i32) -> (i32, i32) {
    %c0_i32 = arith.constant 0 : i32
    %c0_i32_0 = arith.constant 0 : i32
    %c0_i32_1 = arith.constant 0 : i32
    return %c0_i32, %c0_i32_0 : i32, i32
  }
  func.func @transform_4(%arg0: i32) -> (i32, i32) {
    %c0_i32 = arith.constant 0 : i32
    %c0_i32_0 = arith.constant 0 : i32
    return %arg0, %c0_i32 : i32, i32
  }
}

</mosaic_0001>

<bundles_post_ra>
// kernel: eq.1
= control target key start
LH: loop header
LB: loop body
LE: loop exit
PB: predicated region body
PF: predicated region fallthrough
CT: control target
= control target key end

     0   :  { %vm11_vm0 = vcmask 130048   ;;  %s70_s10 = smov 80   ;;  %s71_s11 = smov 96   ;;  %vm17_vm1 = vcmask 1048448   ;;  %vm23_vm2 = vcmask 917248   ;;  %vm29_vm3 = vcmask 786048   ;;  %s95_s0 = inlined_call_operand.vmem [shape: s32[2,4,16], index: 0, kind: input, shape index: {}]   ;;  %s96_s1 = inlined_call_operand.vmem [shape: s32[128], index: 1, kind: output, shape index: {}]  }
   0x1   :  { %v61_v0 = vld [vmem:[%s95_s0 + $0x4] sm:$0xf]  ;;  %v8_v1 = vld [vmem:[%s95_s0] sm:$0xf]  ;;  %s69_s0 = smov 112   ;;  %s72_s12 = smov 64  }
   0x2   :  { %7 = vst [vmem:[#allocation1 + $0x8] sm:$0xf] %v61_v0  ;;  %9 = vst [vmem:[#allocation1] sm:$0xf] %v8_v1  ;;  %s73_s13 = smov 48   ;;  %s74_s14 = smov 32  }
   0x3   :  { %s75_s15 = smov 16   ;;  %vm35_vm4 = vcmask 654848   ;;  %vm41_vm5 = vcmask 523648   ;;  %vm47_vm6 = vcmask 392448   ;;  %vm53_vm7 = vcmask 261248  }
   0x9   :  { %v14_v2 = vld [vmem:[#allocation1 + $0xb] sm:$0x1]   ;;  %v26_v3 = vld [vmem:[#allocation1 + $0x9] sm:$0x1]   ;;  %v20_v4 = vld [vmem:[#allocation1 + $0xa] sm:$0x1]  }
   0xa   :  { %15 = vrot.lane.b32.xlu0 %v14_v2, %s69_s0  ;;  %27 = vrot.lane.b32.xlu1 %v26_v3, %s70_s10  ;;  %v32_v5 = vld [vmem:[#allocation1 + $0x8] sm:$0x1]   ;;  %v10_v6 = vld [vmem:[#allocation1] sm:$0x1]   ;;  %v38_v7 = vld [vmem:[#allocation1 + $0x3] sm:$0x1]  }
   0xb   :  { %12 = vst.msk [vmem:[#allocation0] sm:$0x1] %vm11_vm0, %v10_v6   ;;  %v44_v8 = vld [vmem:[#allocation1 + $0x2] sm:$0x1]   ;;  %v50_v9 = vld [vmem:[#allocation1 + $0x1] sm:$0x1]  }
   0xe   :  { %21 = vrot.lane.b32.xlu0 %v20_v4, %s71_s11  ;;  %33 = vrot.lane.b32.xlu1 %v32_v5, %s72_s12 }
  0x12   :  { %39 = vrot.lane.b32.xlu0 %v38_v7, %s73_s13  ;;  %45 = vrot.lane.b32.xlu1 %v44_v8, %s74_s14 }
  0x16   :  { %51 = vrot.lane.b32.xlu0 %v50_v9, %s75_s15 }
  0x7c   :  { %v16_v10 = vpop.permute.xlu0 %15   ;;  %v28_v11 = vpop.permute.xlu1 %27  }
  0x7d   :  { %18 = vst.msk [vmem:[#allocation0] sm:$0x1] %vm17_vm1, %v16_v10  }
  0x80   :  { %v22_v12 = vpop.permute.xlu0 %21   ;;  %v34_v13 = vpop.permute.xlu1 %33  }
  0x81   :  { %24 = vst.msk [vmem:[#allocation0] sm:$0x1] %vm23_vm2, %v22_v12  }
  0x82   :  { %30 = vst.msk [vmem:[#allocation0] sm:$0x1] %vm29_vm3, %v28_v11  }
  0x83   :  { %36 = vst.msk [vmem:[#allocation0] sm:$0x1] %vm35_vm4, %v34_v13  }
  0x84   :  { %v40_v14 = vpop.permute.xlu0 %39   ;;  %v46_v15 = vpop.permute.xlu1 %45  }
  0x85   :  { %42 = vst.msk [vmem:[#allocation0] sm:$0x1] %vm41_vm5, %v40_v14  }
  0x86   :  { %48 = vst.msk [vmem:[#allocation0] sm:$0x1] %vm47_vm6, %v46_v15  }
  0x88   :  { %v52_v16 = vpop.permute.xlu0 %51  }
  0x89   :  { %54 = vst.msk [vmem:[#allocation0] sm:$0x1] %vm53_vm7, %v52_v16  }
  0x90   :  { %v58_v17 = vld [vmem:[#allocation0] sm:$0x1] }
  0x91   :  { %60 = vst [vmem:[%s96_s1] sm:$0x1] %v58_v17 }

// kernel: _patch_embed_forward.1
= control target key start
LH: loop header
LB: loop body
LE: loop exit
PB: predicated region body
PF: predicated region fallthrough
CT: control target
= control target key end

     0   :  { %s743_s15 = smov 0   ;;  %s789_s0 = inlined_call_operand.vmem [shape: bf16[128,16], index: 0, kind: input, shape index: {}]   ;;  %s790_s1 = inlined_call_operand.vmem [shape: f32[128,5], index: 1, kind: input, shape index: {}]   ;;  %s791_s2 = inlined_call_operand.vmem [shape: bf16[16,128], index: 2, kind: input, shape index: {}]   ;;  %s792_s3 = inlined_call_operand.vmem [shape: f32[5,128], index: 3, kind: input, shape index: {}]   ;;  %s793_s4 = inlined_call_operand.vmem [shape: bf16[128,128], index: 4, kind: output, shape index: {}]  }
   0x1 LB: > { %s589_s16 = sadd.s32 4294967295, %s716_s15   ;;  %p593_p0 = scmp.ge.s32.totalorder %s716_s15, 1  ;;  %s716_s15 = sphi %s743_s15, %s14_s15  }
   0x2   : > { %p174_p1 = scmp.lt.s32.totalorder %s716_s15, 3 }
   0x4   : > { %p175_p2 = pnand %p593_p0, %p174_p1 }
   0x5   : > { %v242_v0 = vld [vmem:[%s792_s3] sm:$0x1f] (!%p175_p2)  ;;  %vm268_vm0 = vcmask (!%p175_p2), 1044480   ;;  %s594_s21 = sshll.u32 (!%p175_p2), %s589_s16, 3  ;;  %vm243_vm1 = vcmask (!%p175_p2), 39936   ;;  %vm403_vm2 = vcmask (!%p175_p2), 130048  }
   0x6   : > { %178 = sbr.rel (%p175_p2) target bundleno = 248 (0xf8), region = 36  ;;  %v705_v1 = vld [vmem:[%s791_s2] sm:$0xff] (!%p175_p2)   ;;  %673 = vmatprep.subr.msk.mxu0 (!%p175_p2), %vm268_vm0, %v242_v0  ;;  %p206_p3 = scmp.lt.s32.totalorder (!%p175_p2), %s594_s21, 15 }
   0x7   : > { %687 = vmatprep.subr.bf16.mxu1 (!%p175_p2), %v705_v1  ;;  %674 = vmatpush3.msk.msra.mxu0 (!%p175_p2), %vm268_vm0, %v242_v0 }
   0x8   : > { %688 = vmatpush3.bf16.msra.mxu1 (!%p175_p2), %v705_v1 }
   0xd   : > { %s795_s21 = smov (!%p206_p3, %s594_s21), 15 }
   0xe   : > { %s597_s22 = sshll.u32 %s795_s21, 3  ;;  %s595_s23 = sshll.u32 %s795_s21, 2 }
   0xf   : > { %s215_s26 = scalar_lea.vmem %s790_s1, %s597_s22  ;;  %s209_s29 = scalar_lea.vmem %s789_s0, %s595_s23 }
  0x10   : > { %v234_v2 = vld [vmem:[%s215_s26] sm:$0xff]  ;;  %v235_v3 = vld [vmem:[%s215_s26 + $0x8] sm:$0xff]  ;;  %v236_v6 = vld [vmem:[%s215_s26 + $0x10] sm:$0xff]  ;;  %s221_s6 = scalar_lea.vmem %s793_s4, %s595_s23 }
  0x11   : > { %675 = vmatprep.mubr.msk.f32.mxu0 %vm243_vm1, %v234_v2  ;;  %v706_v4 = vld [vmem:[%s209_s29] sm:$0xff]   ;;  %v707_v5 = vld [vmem:[%s209_s29 + $0x8] sm:$0xff]   ;;  %v237_v7 = vld [vmem:[%s215_s26 + $0x18] sm:$0xff] }
  0x12   : > { %676 = vmatmul.mubr.msk.f32.vlgmr.msra.gmra.mrb[0].mxu0 %vm243_vm1, %v235_v3  ;;  %689 = vmatprep.mubr.msk.bf16.mxu1 %vm403_vm2, %v706_v4  ;;  %v238_v8 = vld [vmem:[%s215_s26 + $0x20] sm:$0xff]  ;;  %v708_v9 = vld [vmem:[%s209_s29 + $0x10] sm:$0xff]   ;;  %v239_v10 = vld [vmem:[%s215_s26 + $0x28] sm:$0xff] }
  0x13   : > { %678 = vmatprep.mubr.msk.f32.mxu0 %vm243_vm1, %v236_v6  ;;  %690 = vmatmul.mubr.msk.bf16.vlgmr.msra.gmra.mrb[0].mxu1 %vm403_vm2, %v707_v5  ;;  %v709_v11 = vld [vmem:[%s209_s29 + $0x18] sm:$0xff]   ;;  %v240_v12 = vld [vmem:[%s215_s26 + $0x30] sm:$0xff] }
  0x14   : > { %693 = vmatprep.mubr.msk.bf16.mxu1 %vm403_vm2, %v708_v9  ;;  %v241_v13 = vld [vmem:[%s215_s26 + $0x38] sm:$0xff] }
  0x16   : > { %679 = vmatmul.mubr.msk.f32.gmra.mrb[2].mxu0 %vm243_vm1, %v237_v7 }
  0x17   : > { %681 = vmatprep.mubr.msk.f32.mxu0 %vm243_vm1, %v238_v8 }
  0x1a   : > { %682 = vmatmul.mubr.msk.f32.gmra.mrb[4].mxu0 %vm243_vm1, %v239_v10 }
  0x1b   : > { %684 = vmatprep.mubr.msk.f32.mxu0 %vm243_vm1, %v240_v12  ;;  %694 = vmatmul.mubr.msk.bf16.gmra.mrb[4].mxu1 %vm403_vm2, %v709_v11 }
  0x1e   : > { %685 = vmatmul.mubr.msk.f32.gmra.mrb[6].mxu0 %vm243_vm1, %v241_v13 }
  0xe5   : > { %v677_v14 = vpop.f32.mrb[0].mxu0 }
  0xe6   : > { %v338_v15 = vpop.f32.mrb[1].mxu0  ;;  %v691_v16 = vpop.f32.mrb[0].mxu1 }
  0xe7   : > { %v450_v17 = vpop.f32.mrb[1].mxu1 }
  0xe8   : > { %v451_v18 = vadd.f32 %v450_v17, %v338_v15  ;;  %v692_v20 = vpop.f32.mrb[2].mxu1 }
  0xe9   : > { %v680_v19 = vpop.f32.mrb[2].mxu0  ;;  %v453_v23 = vpop.f32.mrb[3].mxu1 }
  0xea   : > { %v462_v21 = vadd.f32 %v692_v20, %v680_v19  ;;  %v348_v22 = vpop.f32.mrb[3].mxu0  ;;  %v454_v25 = vadd.f32 %v677_v14, %v453_v23 }
  0xeb   : > { %v459_v24 = vadd.f32 %v691_v16, %v348_v22 }
  0xec   : > { %v639_v27 = vpack.c.bf16 %v454_v25, %v451_v18 }
  0xed   : > { %v644_v26 = vpack.c.bf16 %v462_v21, %v459_v24  ;;  %v683_v28 = vpop.f32.mrb[4].mxu0 }
  0xee   : > { %v358_v29 = vpop.f32.mrb[5].mxu0  ;;  %640 = vst [vmem:[%s221_s6] sm:$0xff] %v639_v27   ;;  %v695_v30 = vpop.f32.mrb[4].mxu1 }
  0xef   : > { %656 = vst [vmem:[%s221_s6 + $0x8] sm:$0xff] %v644_v26   ;;  %v466_v31 = vpop.f32.mrb[5].mxu1 }
  0xf0   : > { %v467_v32 = vadd.f32 %v466_v31, %v358_v29  ;;  %v696_v34 = vpop.f32.mrb[6].mxu1 }
  0xf1   : > { %v686_v33 = vpop.f32.mrb[6].mxu0  ;;  %v469_v37 = vpop.f32.mrb[7].mxu1 }
  0xf2   : > { %v478_v35 = vadd.f32 %v696_v34, %v686_v33  ;;  %v368_v36 = vpop.f32.mrb[7].mxu0  ;;  %v470_v39 = vadd.f32 %v683_v28, %v469_v37 }
  0xf3   : > { %v475_v38 = vadd.f32 %v695_v30, %v368_v36 }
  0xf4   : > { %v649_v41 = vpack.c.bf16 %v470_v39, %v467_v32 }
  0xf5   : > { %v654_v40 = vpack.c.bf16 %v478_v35, %v475_v38 }
  0xf6   : > { %657 = vst [vmem:[%s221_s6 + $0x10] sm:$0xff] %v649_v41  }
  0xf7   : > { %658 = vst [vmem:[%s221_s6 + $0x18] sm:$0xff] %v654_v40  }
  0xf8 PF: > { %s14_s15 = sadd.s32 1, %s716_s15  }
  0xf9   : > { %p11_p4 = scmp.ge.s32.totalorder %s14_s15, 4  }
  0xfb   :  { %13 = sbr.rel (!%p11_p4) target bundleno = 1 (0x1), region = 69 }

</bundles_post_ra>
